<compile_context>
chip_gen: v7x
topology: tpu7x:2x2x1
jax: 0.10.0
libtpu: 0.0.40
codegen_flags: <defaults>
</compile_context>

<pallas_src>
import functools

import numpy as np
import jax
import jax.numpy as jnp
from jax.experimental import pallas as pl
from jax.experimental.pallas import tpu as pltpu


def _round_up(x, m):
    return ((x + m - 1) // m) * m


def _compute_predictions_kernel(y_ref, w_ref, bins_ref, out_ref, *, n_bins):
    """y_ref: (TB, S)   w_ref: (S, TP)   bins_ref: (n_bins-1, TP)
       out_ref: (n_bins+1, TB, TP) slot-major:
         slot 0            = prediction evaluations (MXU matmul)
         slots 1..n_bins   = "first matching bin wins" one-hot."""
    # --- step 1: prediction evaluations (lane-dense padded MXU matmul) ---------
    vals = jnp.dot(y_ref[...], w_ref[...], preferred_element_type=jnp.float32)  # (TB, TP)
    out_ref[0] = vals

    # --- step 2+3: first-match binning, kept 2-D, one clean store per slot -----
    found = jnp.zeros(vals.shape, dtype=jnp.bool_)
    for k in range(n_bins - 1):                       # static, tiny trip count
        thr = bins_ref[k, :]                          # (TP,)
        hit = jnp.logical_and(vals < thr[None, :], jnp.logical_not(found))
        out_ref[k + 1] = hit.astype(jnp.float32)
        found = jnp.logical_or(found, hit)
    out_ref[n_bins] = jnp.logical_not(found).astype(jnp.float32)


def _tpu_generation():
    try:
        kind = jax.devices()[0].device_kind.lower()
    except Exception:
        return "unknown"
    if "v7" in kind:
        return "v7"
    if "v6" in kind:
        return "v6"
    if "v5" in kind:
        return "v5"
    return "unknown"


def _tile_defaults():
    gen = _tpu_generation()
    if gen in ("v5", "v6"):
        # 128 MiB physical VMEM: larger blocks amortize per-step overhead and
        # give bigger, more BW-efficient output DMAs.
        return dict(max_tb=512, max_tp=1024, vmem_limit=96 * 1024 * 1024, cores=1)
    if gen == "v7":
        # 64 MiB physical / 32 MiB scoped VMEM, 2 TensorCores.
        return dict(max_tb=256, max_tp=512, vmem_limit=32 * 1024 * 1024, cores=2)
    return dict(max_tb=256, max_tp=512, vmem_limit=32 * 1024 * 1024, cores=1)


def compute_predictions_pallas(y, w, bins, n_bins, *, layout="reference",
                               max_tb=None, max_tp=None, vmem_limit=None):
    """Pallas port of GroundTruthModel.compute_predictions for one prediction group.

    y: (B, S, 1) target tensor.  w: (S, P) linear-evaluation weights standing in
    for predictions['eval'][i](output).  bins: (n_bins-1, P) thresholds.
    layout="reference"  -> (B, P, n_bins+1), exactly the numpy reference layout.
    layout="slot_major" -> kernel-native (n_bins+1, B, P), no wrapper transpose.
    """
    n_bins = int(n_bins)
    assert n_bins >= 2, "compute_predictions needs at least 2 bins"

    defaults = _tile_defaults()
    max_tb = defaults["max_tb"] if max_tb is None else max_tb
    max_tp = defaults["max_tp"] if max_tp is None else max_tp
    vmem_limit = defaults["vmem_limit"] if vmem_limit is None else vmem_limit

    y2d = jnp.squeeze(jnp.asarray(y, jnp.float32), axis=2)    # == output.squeeze(2)
    w = jnp.asarray(w, jnp.float32)
    bins = jnp.asarray(bins, jnp.float32)
    B, S = y2d.shape
    P = w.shape[1]
    assert bins.shape == (n_bins - 1, P)

    # Lane-dense P tiles (x128), sublane-aligned batch tiles (x8).
    tb = min(max_tb, _round_up(B, 8))
    tp = min(max_tp, _round_up(P, 128))
    b_pad = _round_up(B, tb)
    p_pad = _round_up(P, tp)

    # v7x: best-effort split into >=2 "parallel" grid steps so both cores work.
    if defaults["cores"] >= 2 and (b_pad // tb) * (p_pad // tp) < 2:
        if tb >= 16 and B > tb // 2:
            tb = _round_up(tb // 2, 8)
            b_pad = _round_up(B, tb)
        elif tp >= 256 and P > tp // 2:
            tp = _round_up(tp // 2, 128)
            p_pad = _round_up(P, tp)

    s_pad = _round_up(S, 128)

    y_p = jnp.pad(y2d, ((0, b_pad - B), (0, s_pad - S)))
    w_p = jnp.pad(w, ((0, s_pad - S), (0, p_pad - P)))
    bins_p = jnp.pad(bins, ((0, 0), (0, p_pad - P)))

    kernel = functools.partial(_compute_predictions_kernel, n_bins=n_bins)
    out_shape = jax.ShapeDtypeStruct((n_bins + 1, b_pad, p_pad), jnp.float32)

    if p_pad == tp:
        # Single P tile: 1-D grid over batch.  w/bins block indices are constant
        # so they are DMA'd into VMEM once for the whole launch.
        res = pl.pallas_call(
            kernel,
            out_shape=out_shape,
            grid=(b_pad // tb,),
            in_specs=[
                pl.BlockSpec((tb, s_pad), lambda i: (i, 0)),
                pl.BlockSpec((s_pad, tp), lambda i: (0, 0)),
                pl.BlockSpec((n_bins - 1, tp), lambda i: (0, 0)),
            ],
            out_specs=pl.BlockSpec((n_bins + 1, tb, tp), lambda i: (0, i, 0)),
            compiler_params=pltpu.CompilerParams(
                dimension_semantics=("parallel",),
                vmem_limit_bytes=vmem_limit),
        )(y_p, w_p, bins_p)
    else:
        # P tiles on the OUTER grid axis: the (s_pad, tp) weight block index is
        # constant across the inner batch loop, so the larger operand is not
        # re-streamed; only the small y tile cycles.
        res = pl.pallas_call(
            kernel,
            out_shape=out_shape,
            grid=(p_pad // tp, b_pad // tb),
            in_specs=[
                pl.BlockSpec((tb, s_pad), lambda pj, bi: (bi, 0)),
                pl.BlockSpec((s_pad, tp), lambda pj, bi: (0, pj)),
                pl.BlockSpec((n_bins - 1, tp), lambda pj, bi: (0, pj)),
            ],
            out_specs=pl.BlockSpec((n_bins + 1, tb, tp), lambda pj, bi: (0, bi, pj)),
            compiler_params=pltpu.CompilerParams(
                dimension_semantics=("parallel", "parallel"),
                vmem_limit_bytes=vmem_limit),
        )(y_p, w_p, bins_p)

    if layout == "slot_major":
        # Kernel-native layout, no transpose at all (preferred for consumers
        # that can aggregate in this layout).
        return res[:, :B, :P]                                  # (n_bins+1, B, P)
    # Reference layout: slice away ALL padding (batch AND P) before transposing.
    return jnp.transpose(res[:, :B, :P], (1, 2, 0))            # (B, P, n_bins+1)


class GroundTruthModelPallas:
    """JAX/Pallas port of GroundTruthModel.forward.

    `predictions['eval']` objects (callable + `.bins`) are represented
    synthetically as a linear-evaluation weight matrix W (n_steps, P) and a
    bins matrix (n_bins-1, P); deterministic synthetic stand-in, no
    checkpoint / DataReader is loaded.
    """

    def __init__(self, mean_return=0.0, dev_return=1.0, log_samples=(1, 2, 4)):
        self.mean = float(mean_return)
        self.dev = float(dev_return)
        self.log_samples = list(log_samples)

    def rescale_return(self, ret):
        return ret * self.dev + self.mean

    def forward(self, input0, mode, n_bins=None, y=None, n_steps=None,
                predictions=None, binary_predictions=None, binning=False):
        length = len(self.log_samples)
        if binning:
            a = compute_predictions_pallas(
                y, predictions["weights"], predictions["bins"], n_bins)
            b = compute_predictions_pallas(
                y, binary_predictions["weights"], binary_predictions["bins"], 2)
            return [a] * length, [b] * length
        return [y] * length


def _reference_compute_predictions(y, w, bins, n_bins):
    """numpy reference mirroring the original PyTorch/numpy loop exactly."""
    output = np.asarray(y).squeeze(2)                          # (B, S)
    batch_size = output.shape[0]
    n_predictions = w.shape[1]
    pred_bins = np.asarray(bins)                               # (n_bins-1, P)
    res = np.zeros((n_bins + 1, batch_size, n_predictions))
    res[0, :, :] = output @ np.asarray(w)
    treated = np.zeros((batch_size, n_predictions), dtype=bool)
    for index in range(n_bins - 1):
        good = np.logical_and(res[0, :, :] < pred_bins[index, :], np.logical_not(treated))
        res[index + 1, good] = 1
        treated = np.logical_or(treated, good)
    res[n_bins, np.logical_not(treated)] = 1
    return res.transpose(1, 2, 0)


if __name__ == "__main__":
    key = jax.random.PRNGKey(0)
    k_y, k_w, k_bw, k_off, k_y2, k_w2, k_b2 = jax.random.split(key, 7)

    # ---- small shapes implied by the module: batch=2, n_steps=8, 4 preds, 5 bins
    B, S, P, NB = 2, 8, 4, 5
    y = jax.random.normal(k_y, (B, S, 1), dtype=jnp.float32)

    w_pred = jax.random.normal(k_w, (S, P), dtype=jnp.float32) * 0.5
    bins_pred = (jnp.linspace(-1.0, 1.0, NB - 1, dtype=jnp.float32)[:, None]
                 + 0.1 * jax.random.normal(k_off, (NB - 1, P), dtype=jnp.float32))
    # Sortedness is NOT required (first-match-wins is exact), just realistic.
    bins_pred = jnp.sort(bins_pred, axis=0)

    w_bin = jax.random.normal(k_bw, (S, P), dtype=jnp.float32) * 0.5
    bins_bin = jnp.zeros((1, P), dtype=jnp.float32)

    model = GroundTruthModelPallas(mean_return=0.0, dev_return=1.0, log_samples=[1, 2, 4])

    # binning path (the Pallas hot path)
    a_list, b_list = model.forward(
        None, mode="eval", n_bins=NB, y=y,
        predictions={"weights": w_pred, "bins": bins_pred},
        binary_predictions={"weights": w_bin, "bins": bins_bin},
        binning=True)
    a = jax.block_until_ready(a_list[0])
    b = jax.block_until_ready(b_list[0])

    # non-binning path (pass-through, as in the reference module)
    passthrough = model.forward(None, mode="eval", y=y, binning=False)
    jax.block_until_ready(passthrough[0])

    # validate against a numpy re-implementation of the original loop
    a_ref = _reference_compute_predictions(np.asarray(y), np.asarray(w_pred),
                                           np.asarray(bins_pred), NB)
    b_ref = _reference_compute_predictions(np.asarray(y), np.asarray(w_bin),
                                           np.asarray(bins_bin), 2)
    np.testing.assert_allclose(np.asarray(a), a_ref, rtol=1e-5, atol=1e-5)
    np.testing.assert_allclose(np.asarray(b), b_ref, rtol=1e-5, atol=1e-5)
    assert a.shape == (B, P, NB + 1) and b.shape == (B, P, 3)
    assert len(a_list) == len(model.log_samples) and len(passthrough) == len(model.log_samples)

    # kernel-native slot-major layout (no wrapper transpose at all)
    a_native = jax.block_until_ready(
        compute_predictions_pallas(y, w_pred, bins_pred, NB, layout="slot_major"))
    np.testing.assert_allclose(np.asarray(a_native), a_ref.transpose(2, 0, 1),
                               rtol=1e-5, atol=1e-5)

    # multi-tile path (forced tiny tiles) to exercise the weight-resident 2-D grid.
    # Inputs quantized to multiples of 0.5 / thresholds offset by 0.125 so the
    # f32 matmul is exact and no value can sit on a bin boundary.
    B2, S2, P2, NB2 = 20, 16, 260, 4
    y2 = (jnp.round(jax.random.normal(k_y2, (B2, S2, 1)) * 2.0) / 2.0).astype(jnp.float32)
    w2 = (jnp.round(jax.random.normal(k_w2, (S2, P2)) * 2.0) / 2.0).astype(jnp.float32)
    bins2 = jnp.sort(jnp.round(jax.random.normal(k_b2, (NB2 - 1, P2)) * 4.0) / 4.0 + 0.125,
                     axis=0).astype(jnp.float32)
    out2 = jax.block_until_ready(
        compute_predictions_pallas(y2, w2, bins2, NB2, max_tb=8, max_tp=128))
    ref2 = _reference_compute_predictions(np.asarray(y2), np.asarray(w2),
                                          np.asarray(bins2), NB2)
    np.testing.assert_allclose(np.asarray(out2), ref2, rtol=1e-5, atol=1e-5)

    print("KERNEL_OK")
</pallas_src>

<mosaic_0001>
module attributes {stable_mosaic.version = 11 : i64} {
  func.func @_compute_predictions_kernel(%arg0: i32, %arg1: memref<8x128xf32, #tpu.memory_space<vmem>>, %arg2: memref<128x128xf32, #tpu.memory_space<vmem>>, %arg3: memref<4x128xf32, #tpu.memory_space<vmem>>, %arg4: memref<6x8x128xf32, #tpu.memory_space<vmem>>) attributes {dimension_semantics = [#tpu.dimension_semantics<parallel>], iteration_bounds = array<i64: 1>, scalar_prefetch = 0 : i64, scratch_operands = 0 : i64, tpu.core_type = #tpu.core_type<tc>, window_params = [{transform_indices = @transform_0, window_bounds = array<i64: 8, 128>}, {pipeline_mode = #tpu.pipeline_mode<synchronous>, transform_indices = @transform_1, window_bounds = array<i64: 128, 128>}, {pipeline_mode = #tpu.pipeline_mode<synchronous>, transform_indices = @transform_2, window_bounds = array<i64: 4, 128>}, {transform_indices = @transform_3, window_bounds = array<i64: 6, 8, 128>}]} {
    %c0 = arith.constant 0 : index
    %c0_0 = arith.constant 0 : index
    %0 = vector.load %arg1[%c0, %c0_0] : memref<8x128xf32, #tpu.memory_space<vmem>>, vector<8x128xf32>
    %c0_1 = arith.constant 0 : index
    %c0_2 = arith.constant 0 : index
    %1 = vector.load %arg2[%c0_1, %c0_2] : memref<128x128xf32, #tpu.memory_space<vmem>>, vector<128x128xf32>
    %cst = arith.constant dense<0.000000e+00> : vector<8x128xf32>
    %2 = tpu.matmul %0, %1, %cst {dimension_numbers = #tpu.dot_dimension_numbers<[1], [0], [0], [1], [0, 0, 1, 1], [], []>} : vector<8x128xf32>, vector<128x128xf32>, vector<8x128xf32> -> vector<8x128xf32>
    %c0_3 = arith.constant 0 : index
    %c0_4 = arith.constant 0 : index
    %c0_5 = arith.constant 0 : index
    %3 = vector.load %arg4[%c0_3, %c0_4, %c0_5] : memref<6x8x128xf32, #tpu.memory_space<vmem>>, vector<1x8x128xf32>
    %4 = vector.shape_cast %3 : vector<1x8x128xf32> to vector<8x128xf32>
    %5 = vector.shape_cast %2 : vector<8x128xf32> to vector<1x8x128xf32>
    tpu.vector_store %arg4[%c0_3, %c0_4, %c0_5], %5 {strides = array<i32>} : memref<6x8x128xf32, #tpu.memory_space<vmem>>, vector<1x8x128xf32>,
    %false = arith.constant false
    %6 = vector.broadcast %false : i1 to vector<8x128xi1>
    %c0_6 = arith.constant 0 : index
    %c0_7 = arith.constant 0 : index
    %7 = vector.load %arg3[%c0_6, %c0_7] : memref<4x128xf32, #tpu.memory_space<vmem>>, vector<1x128xf32>
    %8 = vector.shape_cast %7 : vector<1x128xf32> to vector<128xf32>
    %9 = vector.shape_cast %8 : vector<128xf32> to vector<1x128xf32>
    %10 = vector.broadcast %9 : vector<1x128xf32> to vector<8x128xf32>
    %11 = arith.cmpf olt, %2, %10 : vector<8x128xf32>
    %cst_8 = arith.constant dense<true> : vector<8x128xi1>
    %12 = arith.xori %6, %cst_8 : vector<8x128xi1>
    %13 = arith.andi %11, %12 : vector<8x128xi1>
    %14 = arith.extui %13 : vector<8x128xi1> to vector<8x128xi32>
    %15 = arith.sitofp %14 : vector<8x128xi32> to vector<8x128xf32>
    %c1 = arith.constant 1 : index
    %c0_9 = arith.constant 0 : index
    %c0_10 = arith.constant 0 : index
    %16 = vector.load %arg4[%c1, %c0_9, %c0_10] : memref<6x8x128xf32, #tpu.memory_space<vmem>>, vector<1x8x128xf32>
    %17 = vector.shape_cast %16 : vector<1x8x128xf32> to vector<8x128xf32>
    %18 = vector.shape_cast %15 : vector<8x128xf32> to vector<1x8x128xf32>
    tpu.vector_store %arg4[%c1, %c0_9, %c0_10], %18 {strides = array<i32>} : memref<6x8x128xf32, #tpu.memory_space<vmem>>, vector<1x8x128xf32>,
    %19 = arith.ori %6, %13 : vector<8x128xi1>
    %c1_11 = arith.constant 1 : index
    %c0_12 = arith.constant 0 : index
    %20 = vector.load %arg3[%c1_11, %c0_12] : memref<4x128xf32, #tpu.memory_space<vmem>>, vector<1x128xf32>
    %21 = vector.shape_cast %20 : vector<1x128xf32> to vector<128xf32>
    %22 = vector.shape_cast %21 : vector<128xf32> to vector<1x128xf32>
    %23 = vector.broadcast %22 : vector<1x128xf32> to vector<8x128xf32>
    %24 = arith.cmpf olt, %2, %23 : vector<8x128xf32>
    %cst_13 = arith.constant dense<true> : vector<8x128xi1>
    %25 = arith.xori %19, %cst_13 : vector<8x128xi1>
    %26 = arith.andi %24, %25 : vector<8x128xi1>
    %27 = arith.extui %26 : vector<8x128xi1> to vector<8x128xi32>
    %28 = arith.sitofp %27 : vector<8x128xi32> to vector<8x128xf32>
    %c2 = arith.constant 2 : index
    %c0_14 = arith.constant 0 : index
    %c0_15 = arith.constant 0 : index
    %29 = vector.load %arg4[%c2, %c0_14, %c0_15] : memref<6x8x128xf32, #tpu.memory_space<vmem>>, vector<1x8x128xf32>
    %30 = vector.shape_cast %29 : vector<1x8x128xf32> to vector<8x128xf32>
    %31 = vector.shape_cast %28 : vector<8x128xf32> to vector<1x8x128xf32>
    tpu.vector_store %arg4[%c2, %c0_14, %c0_15], %31 {strides = array<i32>} : memref<6x8x128xf32, #tpu.memory_space<vmem>>, vector<1x8x128xf32>,
    %32 = arith.ori %19, %26 : vector<8x128xi1>
    %c2_16 = arith.constant 2 : index
    %c0_17 = arith.constant 0 : index
    %33 = vector.load %arg3[%c2_16, %c0_17] : memref<4x128xf32, #tpu.memory_space<vmem>>, vector<1x128xf32>
    %34 = vector.shape_cast %33 : vector<1x128xf32> to vector<128xf32>
    %35 = vector.shape_cast %34 : vector<128xf32> to vector<1x128xf32>
    %36 = vector.broadcast %35 : vector<1x128xf32> to vector<8x128xf32>
    %37 = arith.cmpf olt, %2, %36 : vector<8x128xf32>
    %cst_18 = arith.constant dense<true> : vector<8x128xi1>
    %38 = arith.xori %32, %cst_18 : vector<8x128xi1>
    %39 = arith.andi %37, %38 : vector<8x128xi1>
    %40 = arith.extui %39 : vector<8x128xi1> to vector<8x128xi32>
    %41 = arith.sitofp %40 : vector<8x128xi32> to vector<8x128xf32>
    %c3 = arith.constant 3 : index
    %c0_19 = arith.constant 0 : index
    %c0_20 = arith.constant 0 : index
    %42 = vector.load %arg4[%c3, %c0_19, %c0_20] : memref<6x8x128xf32, #tpu.memory_space<vmem>>, vector<1x8x128xf32>
    %43 = vector.shape_cast %42 : vector<1x8x128xf32> to vector<8x128xf32>
    %44 = vector.shape_cast %41 : vector<8x128xf32> to vector<1x8x128xf32>
    tpu.vector_store %arg4[%c3, %c0_19, %c0_20], %44 {strides = array<i32>} : memref<6x8x128xf32, #tpu.memory_space<vmem>>, vector<1x8x128xf32>,
    %45 = arith.ori %32, %39 : vector<8x128xi1>
    %c3_21 = arith.constant 3 : index
    %c0_22 = arith.constant 0 : index
    %46 = vector.load %arg3[%c3_21, %c0_22] : memref<4x128xf32, #tpu.memory_space<vmem>>, vector<1x128xf32>
    %47 = vector.shape_cast %46 : vector<1x128xf32> to vector<128xf32>
    %48 = vector.shape_cast %47 : vector<128xf32> to vector<1x128xf32>
    %49 = vector.broadcast %48 : vector<1x128xf32> to vector<8x128xf32>
    %50 = arith.cmpf olt, %2, %49 : vector<8x128xf32>
    %cst_23 = arith.constant dense<true> : vector<8x128xi1>
    %51 = arith.xori %45, %cst_23 : vector<8x128xi1>
    %52 = arith.andi %50, %51 : vector<8x128xi1>
    %53 = arith.extui %52 : vector<8x128xi1> to vector<8x128xi32>
    %54 = arith.sitofp %53 : vector<8x128xi32> to vector<8x128xf32>
    %c4 = arith.constant 4 : index
    %c0_24 = arith.constant 0 : index
    %c0_25 = arith.constant 0 : index
    %55 = vector.load %arg4[%c4, %c0_24, %c0_25] : memref<6x8x128xf32, #tpu.memory_space<vmem>>, vector<1x8x128xf32>
    %56 = vector.shape_cast %55 : vector<1x8x128xf32> to vector<8x128xf32>
    %57 = vector.shape_cast %54 : vector<8x128xf32> to vector<1x8x128xf32>
    tpu.vector_store %arg4[%c4, %c0_24, %c0_25], %57 {strides = array<i32>} : memref<6x8x128xf32, #tpu.memory_space<vmem>>, vector<1x8x128xf32>,
    %58 = arith.ori %45, %52 : vector<8x128xi1>
    %cst_26 = arith.constant dense<true> : vector<8x128xi1>
    %59 = arith.xori %58, %cst_26 : vector<8x128xi1>
    %60 = arith.extui %59 : vector<8x128xi1> to vector<8x128xi32>
    %61 = arith.sitofp %60 : vector<8x128xi32> to vector<8x128xf32>
    %c5 = arith.constant 5 : index
    %c0_27 = arith.constant 0 : index
    %c0_28 = arith.constant 0 : index
    %62 = vector.load %arg4[%c5, %c0_27, %c0_28] : memref<6x8x128xf32, #tpu.memory_space<vmem>>, vector<1x8x128xf32>
    %63 = vector.shape_cast %62 : vector<1x8x128xf32> to vector<8x128xf32>
    %64 = vector.shape_cast %61 : vector<8x128xf32> to vector<1x8x128xf32>
    tpu.vector_store %arg4[%c5, %c0_27, %c0_28], %64 {strides = array<i32>} : memref<6x8x128xf32, #tpu.memory_space<vmem>>, vector<1x8x128xf32>,
    return
  }
  func.func @transform_0(%arg0: i32) -> (i32, i32) {
    %c0_i32 = arith.constant 0 : i32
    %c0_i32_0 = arith.constant 0 : i32
    return %arg0, %c0_i32 : i32, i32
  }
  func.func @transform_1(%arg0: i32) -> (i32, i32) {
    %c0_i32 = arith.constant 0 : i32
    %c0_i32_0 = arith.constant 0 : i32
    %c0_i32_1 = arith.constant 0 : i32
    return %c0_i32, %c0_i32_0 : i32, i32
  }
  func.func @transform_2(%arg0: i32) -> (i32, i32) {
    %c0_i32 = arith.constant 0 : i32
    %c0_i32_0 = arith.constant 0 : i32
    %c0_i32_1 = arith.constant 0 : i32
    return %c0_i32, %c0_i32_0 : i32, i32
  }
  func.func @transform_3(%arg0: i32) -> (i32, i32, i32) {
    %c0_i32 = arith.constant 0 : i32
    %c0_i32_0 = arith.constant 0 : i32
    %c0_i32_1 = arith.constant 0 : i32
    return %c0_i32, %arg0, %c0_i32_0 : i32, i32, i32
  }
}

</mosaic_0001>

<bundles_post_ra>
// kernel: tpu_custom_call.1
= control target key start
LH: loop header
LB: loop body
LE: loop exit
PB: predicated region body
PF: predicated region fallthrough
CT: control target
= control target key end

     0   :  { %8 = vsyncpa [#allocation3], 0  ;;  %s475_s0 = inlined_call_operand.hbm [shape: f32[8,128], index: 0, kind: input, shape index: {}]   ;;  %s476_s1 = inlined_call_operand.hbm [shape: f32[128,128], index: 1, kind: input, shape index: {}]   ;;  %s477_s2 = inlined_call_operand.vmem [shape: f32[4,128], index: 2, kind: input, shape index: {}]   ;;  %s478_s3 = inlined_call_operand.hbm [shape: f32[6,8,128], index: 3, kind: output, shape index: {}]  }
   0x1   :  { %9 = vsyncpa [#allocation6], 0 }
   0x2   :  { %10 = vsyncpa [#allocation4], 0  ;;  %s367_s12 = smov [#allocation2]   ;;  %s368_s14 = smov [#allocation5]  }
   0x3   :  { %s17_s13 = sshll.u32 %s367_s12, 4  ;;  %s26_s15 = sshll.u32 %s368_s14, 4  ;;  %s18_s13 = int_to_ptr.vmem [resolvable:$true] %s17_s13  ;;  %s396_s15 = int_to_ptr.vmem [resolvable:$true] %s26_s15 }
   0x4   :  { %s295_s18 = scalar_lea.hbm %s475_s0, 128 }
   0x5   :  { %p296_p0 = scmp.ne.s32.totalorder %s475_s0, %s295_s18  ;;  %p299_p1 = scmp.lt.u32.totalorder %s295_s18, %s475_s0 }
   0x7   :  { %p301_p2 = pnand %p299_p1, %p296_p0 }
   0x9   :  { %304 = shalt.err (!%p301_p2)
}
   0xa   :  { %s305_s23 = scalar_lea.vmem %s18_s13, 128  ;;  %p310_p4 = scmp.lt.s32.totalorder %s18_s13, %s18_s13 }
   0xb   :  { %p306_p3 = scmp.ne.s32.totalorder %s18_s13, %s305_s23  ;;  %p311_p5 = scmp.lt.s32.totalorder %s305_s23, %s305_s23 }
   0xd   :  { %p312_p6 = por %p311_p5, %p310_p4 }
   0xf   :  { %p313_p7 = pnand %p312_p6, %p306_p3 }
  0x11   :  { %316 = shalt.err (!%p313_p7)
}
  0x12   :  { %20 = dma.hbm_to_vmem [thread:$0]  %s475_s0, 128, %s18_s13, [#allocation3]  }
  0x13   :  { %s317_s28 = scalar_lea.hbm %s476_s1, 2048 }
  0x14   :  { %p318_p8 = scmp.ne.s32.totalorder %s476_s1, %s317_s28  ;;  %p321_p9 = scmp.lt.u32.totalorder %s317_s28, %s476_s1 }
  0x16   :  { %p323_p10 = pnand %p321_p9, %p318_p8 }
  0x18   :  { %326 = shalt.err (!%p323_p10)
}
  0x19   :  { %s327_s6 = scalar_lea.vmem %s396_s15, 2048  ;;  %p332_p12 = scmp.lt.s32.totalorder %s396_s15, %s396_s15 }
  0x1a   :  { %p328_p11 = scmp.ne.s32.totalorder %s396_s15, %s327_s6  ;;  %p333_p13 = scmp.lt.s32.totalorder %s327_s6, %s327_s6 }
  0x1c   :  { %p334_p0 = por %p333_p13, %p332_p12 }
  0x1e   :  { %p335_p1 = pnand %p334_p0, %p328_p11 }
  0x20   :  { %338 = shalt.err (!%p335_p1)
}
  0x21   :  { %s369_s0 = smov 128   ;;  %s370_s7 = smov 8  }
  0x22   :  { %32 = dma.hbm_to_vmem [thread:$0]  %s476_s1, 2048, %s396_s15, [#allocation6], %s369_s0, %s369_s0, %s370_s7  }
  0x23   :  { %361 = dma.done.wait [#allocation3], 128  }
  0x24   :  { %362 = vsyncadd [#allocation3], 4294967168 }
  0x25   :  { %363 = dma.done.wait [#allocation6], 2048  }
  0x26   :  { %364 = vsyncadd [#allocation6], 4294965248  ;;  %v371_v0 = vmov 0.0|0.0   ;;  %vm372_vm0 = vmmov 0   ;;  %v373_v1 = vmov 0.0   ;;  %v42_v2 = vld [vmem:[#allocation5] sm:$0xff] }
  0x27   :  { %262 = vmatprep.subr.bf16.mxu0 %v371_v0  ;;  %259 = vmatprep.mubr.msk.f32.mxu0 %vm372_vm0, %v373_v1  ;;  %v43_v3 = vld [vmem:[#allocation5 + $0x8] sm:$0xff]  ;;  %v44_v4 = vld [vmem:[#allocation5 + $0x10] sm:$0xff]  ;;  %v45_v6 = vld [vmem:[#allocation5 + $0x18] sm:$0xff]  ;;  %vm374_vm3 = vmmov 1   ;;  %s375_s17 = smov [#allocation7]  }
  0x28   :  { %v263_v5 = vpack.c.bf16 %v43_v3, %v42_v2  ;;  %v266_v7 = vpack.c.bf16 %v45_v6, %v44_v4  ;;  %v46_v8 = vld [vmem:[#allocation5 + $0x20] sm:$0xff]  ;;  %v47_v9 = vld [vmem:[#allocation5 + $0x28] sm:$0xff]  ;;  %v48_v11 = vld [vmem:[#allocation5 + $0x30] sm:$0xff]  ;;  %s188_s18 = sshll.u32 %s375_s17, 4  ;;  %s189_s18 = int_to_ptr.vmem [resolvable:$true] %s188_s18 }
  0x29   :  { %v269_v10 = vpack.c.bf16 %v47_v9, %v46_v8  ;;  %v49_v12 = vld [vmem:[#allocation5 + $0x38] sm:$0xff]  ;;  %v50_v14 = vld [vmem:[#allocation5 + $0x40] sm:$0xff]  ;;  %v51_v15 = vld [vmem:[#allocation5 + $0x48] sm:$0xff]  ;;  %p344_p3 = scmp.lt.s32.totalorder %s189_s18, %s189_s18 }
  0x2a   :  { %264 = vmatpush3.bf16.msra.mxu0 %v263_v5  ;;  %v272_v13 = vpack.c.bf16 %v49_v12, %v48_v11  ;;  %v275_v16 = vpack.c.bf16 %v51_v15, %v50_v14  ;;  %v52_v17 = vld [vmem:[#allocation5 + $0x50] sm:$0xff]  ;;  %v53_v18 = vld [vmem:[#allocation5 + $0x58] sm:$0xff]  ;;  %v54_v20 = vld [vmem:[#allocation5 + $0x60] sm:$0xff] }
  0x2b   :  { %265 = vmatprep.subr.bf16.mxu0 %v371_v0  ;;  %v278_v19 = vpack.c.bf16 %v53_v18, %v52_v17  ;;  %v55_v21 = vld [vmem:[#allocation5 + $0x68] sm:$0xff]  ;;  %v56_v23 = vld [vmem:[#allocation5 + $0x70] sm:$0xff]  ;;  %v57_v24 = vld [vmem:[#allocation5 + $0x78] sm:$0xff] }
  0x2c   :  { %v281_v22 = vpack.c.bf16 %v55_v21, %v54_v20  ;;  %v284_v25 = vpack.c.bf16 %v57_v24, %v56_v23  ;;  %v41_v26 = vld [vmem:[#allocation2] sm:$0xff] }
  0x2d   :  { %v201_v27 = vld [vmem:[%s477_s2] ss:$0 sm:$0xff]  ;;  %v203_v28 = vld [vmem:[%s477_s2 + $0x1] ss:$0 sm:$0xff]  ;;  %v205_v32 = vld [vmem:[%s477_s2 + $0x2] ss:$0 sm:$0xff] }
  0x2e   :  { %267 = vmatpush3.bf16.msra.mxu0 %v266_v7  ;;  %v207_v35 = vld [vmem:[%s477_s2 + $0x3] ss:$0 sm:$0xff]  ;;  %s339_s2 = scalar_lea.vmem %s189_s18, 768 }
  0x2f   :  { %268 = vmatprep.subr.bf16.mxu0 %v371_v0  ;;  %p340_p2 = scmp.ne.s32.totalorder %s189_s18, %s339_s2  ;;  %p345_p4 = scmp.lt.s32.totalorder %s339_s2, %s339_s2 }
  0x31   :  { %p346_p5 = por %p345_p4, %p344_p3 }
  0x32   :  { %270 = vmatpush3.bf16.msra.mxu0 %v269_v10 }
  0x33   :  { %271 = vmatprep.subr.bf16.mxu0 %v371_v0  ;;  %p347_p6 = pnand %p346_p5, %p340_p2 }
  0x36   :  { %273 = vmatpush3.bf16.msra.mxu0 %v272_v13 }
  0x37   :  { %274 = vmatprep.subr.bf16.mxu0 %v371_v0 }
  0x3a   :  { %276 = vmatpush3.bf16.msra.mxu0 %v275_v16 }
  0x3b   :  { %277 = vmatprep.subr.bf16.mxu0 %v371_v0 }
  0x3e   :  { %279 = vmatpush3.bf16.msra.mxu0 %v278_v19 }
  0x3f   :  { %280 = vmatprep.subr.bf16.mxu0 %v371_v0 }
  0x42   :  { %282 = vmatpush3.bf16.msra.mxu0 %v281_v22 }
  0x43   :  { %283 = vmatprep.subr.bf16.mxu0 %v371_v0 }
  0x46   :  { %285 = vmatpush3.bf16.msra.mxu0 %v284_v25 }
  0x49   :  { %260 = vmatmul.mubr.f32.vlgmr.msra.gmra.mrb[0].mxu0 %v41_v26 }
 0x11c   :  { %v124_v29 = vpop.f32.mrb[0].mxu0 }
 0x11d   :  { %128 = vst [vmem:[#allocation7] sm:$0xff] %v124_v29  ;;  %vm134_vm1 = vcmp.lt.f32.partialorder %v124_v29, %v201_v27  ;;  %vm144_vm2 = vcmp.lt.f32.partialorder %v124_v29, %v203_v28  ;;  %v261_v30 = vpop.f32.mrb[1].mxu0  ;;  %vm157_vm7 = vcmp.lt.f32.partialorder %v124_v29, %v205_v32  ;;  %vm170_vm11 = vcmp.lt.f32.partialorder %v124_v29, %v207_v35 }
 0x11e   :  { %v202_v31 = vsel %vm134_vm1, 1.0, %v373_v1  ;;  %vm145_vm4 = vmxor %vm134_vm1, %vm374_vm3 }
 0x11f   :  { %138 = vst [vmem:[#allocation7 + $0x8] sm:$0xff] %v202_v31  ;;  %vm146_vm5 = vmand %vm144_vm2, %vm145_vm4 }
 0x120   :  { %v204_v33 = vsel %vm146_vm5, 1.0, %v373_v1  ;;  %vm443_vm6 = vmor %vm134_vm1, %vm146_vm5 }
 0x121   :  { %150 = vst [vmem:[#allocation7 + $0x10] sm:$0xff] %v204_v33  ;;  %vm158_vm8 = vmxor %vm443_vm6, %vm374_vm3 }
 0x122   :  { %vm159_vm9 = vmand %vm157_vm7, %vm158_vm8 }
 0x123   :  { %v206_v36 = vsel %vm159_vm9, 1.0, %v373_v1  ;;  %vm164_vm10 = vmor %vm443_vm6, %vm159_vm9 }
 0x124   :  { %163 = vst [vmem:[#allocation7 + $0x18] sm:$0xff] %v206_v36  ;;  %vm171_vm12 = vmxor %vm164_vm10, %vm374_vm3 }
 0x125   :  { %vm172_vm13 = vmand %vm170_vm11, %vm171_vm12 }
 0x126   :  { %v208_v37 = vsel %vm172_vm13, 1.0, %v373_v1  ;;  %vm177_vm14 = vmor %vm164_vm10, %vm172_vm13 }
 0x127   :  { %176 = vst [vmem:[#allocation7 + $0x20] sm:$0xff] %v208_v37  ;;  %vm178_vm15 = vmxor %vm177_vm14, %vm374_vm3 }
 0x128   :  { %v209_v38 = vsel %vm178_vm15, 1.0, %v373_v1 }
 0x129   :  { %182 = vst [vmem:[#allocation7 + $0x28] sm:$0xff] %v209_v38 }
 0x12a   :  { %350 = shalt.err (!%p347_p6)
}
 0x12b   :  { %s351_s21 = scalar_lea.hbm %s478_s3, 768 }
 0x12c   :  { %p352_p7 = scmp.ne.s32.totalorder %s478_s3, %s351_s21  ;;  %p355_p8 = scmp.lt.u32.totalorder %s351_s21, %s478_s3 }
 0x12e   :  { %p357_p9 = pnand %p355_p8, %p352_p7 }
 0x130   :  { %360 = shalt.err (!%p357_p9)
}
 0x131   :  { %194 = dma.vmem_to_hbm [thread:$0]  %s189_s18, 768, %s478_s3, [#allocation4], %s369_s0, %s369_s0, %s370_s7  }
 0x132   :  { %365 = dma.done.wait [#allocation4], 768  }
 0x133   :  { %366 = vsyncadd [#allocation4], 4294966528 }
 0x134   :  { %198 = vsyncpa [#allocation3], 1 }
 0x135   :  { %199 = vsyncpa [#allocation6], 1 }
 0x136   :  { %200 = vsyncpa [#allocation4], 1 }

</bundles_post_ra>
